<compile_context>
chip_gen: v7x
topology: tpu7x:2x2x1
jax: 0.10.0
libtpu: 0.0.40
codegen_flags: <defaults>
</compile_context>

<pallas_src>
import jax
import jax.numpy as jnp
import numpy as np
from jax.experimental import pallas as pl
from jax.experimental.pallas import tpu as pltpu

_EPS = 1e-6              # F.pairwise_distance default eps (added to the difference)
_MAX_SINGLE_D = 2048     # feature dims up to this are a single lane block
# Double-buffered x1/x2 tile budget: 24 MiB is past the DMA-efficiency knee on
# v5e/v6e and still safe against v7x's 64 MiB physical VMEM per TensorCore.
_VMEM_TILE_BUDGET = 24 * 1024 * 1024
_VMEM_LIMIT_BYTES = 48 * 1024 * 1024   # <= 48 MiB keeps v7x safe; fine for v5e/v6e
_MAX_TB = 2048


def _round_up(x, m):
    return (x + m - 1) // m * m


def _cdiv(a, b):
    return (a + b - 1) // b


def _make_kernel(margin, B, D, TB, TD, nd):
    col_pad = (D % TD) != 0          # boundary feature tile has padded columns
    lane_blocks = (TD % 128) == 0    # accumulate per-128-lane partials (pure VALU)

    def kernel(x1_ref, x2_ref, lbl_ref, out_ref, d2_ref):
        i = pl.program_id(0)   # batch tile (parallel)
        j = pl.program_id(1)   # feature tile (reduction axis)

        @pl.when(j == 0)
        def _init():
            d2_ref[...] = jnp.zeros_like(d2_ref)

        def accum(mask_cols):
            x1 = x1_ref[...].astype(jnp.float32)
            x2 = x2_ref[...].astype(jnp.float32)
            diff = (x1 - x2) + _EPS            # eps BEFORE the column mask
            if mask_cols:
                col = jax.lax.broadcasted_iota(jnp.int32, (TB, TD), 1) + j * TD
                diff = jnp.where(col < D, diff, 0.0)   # select: pad cols may be garbage
            sq = diff * diff
            if lane_blocks:
                # Per-128-lane partial sums: static lane-chunk slices + VALU adds.
                acc = sq[:, 0:128]
                for c in range(1, TD // 128):
                    acc = acc + sq[:, c * 128:(c + 1) * 128]
                d2_ref[...] += acc
            else:
                # Only when nd == 1 and D is not a multiple of 128: one-off reduce.
                d2_ref[:, 0:1] += jnp.sum(sq, axis=1, keepdims=True)

        if col_pad and nd > 1:
            # Column mask only on the boundary feature tile; all other feature
            # steps take the unmasked (iota/select-free) path.
            @pl.when(j < nd - 1)
            def _plain():
                accum(False)

            @pl.when(j == nd - 1)
            def _masked():
                accum(True)
        else:
            accum(col_pad)

        @pl.when(j == nd - 1)
        def _finalize():
            d2 = jnp.sum(d2_ref[...], axis=1, keepdims=True)   # single XLU reduce
            d = jnp.sqrt(d2)
            lbl = lbl_ref[...].astype(jnp.float32)              # (TB, 1)
            hinge = jnp.maximum(margin - d, 0.0)
            per_row = (1.0 - lbl) * d2 + lbl * (hinge * hinge)
            if B % TB != 0:
                # Select (not multiply): padded rows may carry Inf/NaN.
                row = jax.lax.broadcasted_iota(jnp.int32, (TB, 1), 0) + i * TB
                per_row = jnp.where(row < B, per_row, 0.0)
            out_ref[...] = jnp.broadcast_to(jnp.sum(per_row), out_ref.shape)

    return kernel


def contrastive_loss_2(output1, output2, label, margin=2.0):
    """Pallas implementation of ContrastiveLoss_2.forward. Returns a scalar."""
    B, D = output1.shape
    itemsize = int(jnp.dtype(output1.dtype).itemsize)

    # Feature tiling: single full-D block when small, otherwise balanced
    # 128-lane-multiple tiles (no nearly-empty remainder tile).
    if D <= _MAX_SINGLE_D:
        TD = D
    else:
        TD = _round_up(_cdiv(D, _cdiv(D, _MAX_SINGLE_D)), 128)
    nd = _cdiv(D, TD)

    # Batch tiling: multiple of 8 sublanes; dtype-aware budget for the
    # double-buffered x1/x2 tiles (2 inputs * 2 buffers * TB * TD * itemsize).
    max_tb = _VMEM_TILE_BUDGET // (2 * 2 * TD * itemsize)
    TB = max(8, min(_MAX_TB, (max_tb // 8) * 8, _round_up(B, 8)))
    nb = _cdiv(B, TB)
    if nb == 1 and B > 8:
        # Guarantee >= 2 batch tiles so both v7x TensorCores get work
        # (no-op on single-TC v5e/v6e).
        TB = max(8, _round_up(_cdiv(B, 2), 8))
        nb = _cdiv(B, TB)

    label2d = label.reshape(B, 1).astype(jnp.float32)

    out = pl.pallas_call(
        _make_kernel(float(margin), B, D, TB, TD, nd),
        out_shape=jax.ShapeDtypeStruct((nb, 8, 128), jnp.float32),
        grid_spec=pltpu.PrefetchScalarGridSpec(
            num_scalar_prefetch=0,
            grid=(nb, nd),
            in_specs=[
                # (Optional v7x knob: pipeline_mode=pl.Buffered(3) if profile
                # still shows exposed DMA start latency at tile boundaries.)
                pl.BlockSpec((TB, TD), lambda i, j: (i, j)),
                pl.BlockSpec((TB, TD), lambda i, j: (i, j)),
                pl.BlockSpec((TB, 1), lambda i, j: (i, 0)),
            ],
            out_specs=pl.BlockSpec((1, 8, 128), lambda i, j: (i, 0, 0)),
            scratch_shapes=[pltpu.VMEM((TB, 128), jnp.float32)],
        ),
        compiler_params=pltpu.CompilerParams(
            dimension_semantics=("parallel", "arbitrary"),
            vmem_limit_bytes=_VMEM_LIMIT_BYTES,
        ),
        cost_estimate=pl.CostEstimate(
            flops=int(6 * B * D),
            transcendentals=int(B),
            bytes_accessed=int(2 * B * D * itemsize + B * 4 + nb * 8 * 128 * 4),
        ),
    )(output1, output2, label2d)

    partial = out[:, 0, 0]                 # per-batch-tile partial sums
    return jnp.sum(partial) * (1.0 / B)    # mean over the true batch size


def _reference(output1, output2, label, margin=2.0):
    # Pure-JAX reference mirroring the PyTorch forward (sanity check only).
    diff = output1 - output2 + _EPS
    d = jnp.sqrt(jnp.sum(diff * diff, axis=1))
    hinge = jnp.maximum(margin - d, 0.0)
    return jnp.mean((1.0 - label) * d**2 + label * hinge**2)


if __name__ == "__main__":
    key = jax.random.PRNGKey(0)
    keys = jax.random.split(key, 3)

    def run_case(k, B, D, close_pairs=False):
        k1, k2, k3 = jax.random.split(k, 3)
        o1 = jax.random.normal(k1, (B, D), dtype=jnp.float32)
        if close_pairs:  # keep distances < margin so the hinge branch is active
            o2 = o1 + 0.05 * jax.random.normal(k2, (B, D), dtype=jnp.float32)
        else:
            o2 = jax.random.normal(k2, (B, D), dtype=jnp.float32)
        lbl = jax.random.bernoulli(k3, p=0.5, shape=(B,)).astype(jnp.float32)

        loss = jax.block_until_ready(contrastive_loss_2(o1, o2, lbl, margin=2.0))
        ref = _reference(o1, o2, lbl, margin=2.0)
        np.testing.assert_allclose(np.asarray(loss), np.asarray(ref),
                                   rtol=1e-4, atol=1e-6)

    run_case(keys[0], 8, 32)                      # small, single tile
    run_case(keys[1], 13, 200, close_pairs=True)  # ragged batch (nb=2) + hinge branch
    run_case(keys[2], 16, 2100)                   # feature tiling (nd=2) + column mask
    print("KERNEL_OK")
</pallas_src>

<mosaic_0001>
module attributes {stable_mosaic.version = 11 : i64} {
  func.func @kernel(%arg0: i32, %arg1: i32, %arg2: memref<8x32xf32, #tpu.memory_space<vmem>>, %arg3: memref<8x32xf32, #tpu.memory_space<vmem>>, %arg4: memref<8x1xf32, #tpu.memory_space<vmem>>, %arg5: memref<1x8x128xf32, #tpu.memory_space<vmem>>, %arg6: memref<8x128xf32, #tpu.memory_space<vmem>>) attributes {dimension_semantics = [#tpu.dimension_semantics<parallel>, #tpu.dimension_semantics<arbitrary>], iteration_bounds = array<i64: 1, 1>, scalar_prefetch = 0 : i64, scratch_operands = 1 : i64, tpu.core_type = #tpu.core_type<tc>, window_params = [{transform_indices = @transform_0, window_bounds = array<i64: 8, 32>}, {transform_indices = @transform_1, window_bounds = array<i64: 8, 32>}, {transform_indices = @transform_2, window_bounds = array<i64: 8, 1>}, {transform_indices = @transform_3, window_bounds = array<i64: 1, 8, 128>}]} {
    %c0_i32 = arith.constant 0 : i32
    %0 = arith.cmpi eq, %arg1, %c0_i32 : i32
    %1 = arith.extui %0 : i1 to i32
    %c0_i32_0 = arith.constant 0 : i32
    %2 = arith.cmpi ne, %1, %c0_i32_0 : i32
    scf.if %2 {
      %cst_11 = arith.constant 0.000000e+00 : f32
      %17 = vector.broadcast %cst_11 : f32 to vector<8x128xf32>
      %c0_12 = arith.constant 0 : index
      %c0_13 = arith.constant 0 : index
      %18 = vector.load %arg6[%c0_12, %c0_13] : memref<8x128xf32, #tpu.memory_space<vmem>>, vector<8x128xf32>
      tpu.vector_store %arg6[%c0_12, %c0_13], %17 {strides = array<i32>} : memref<8x128xf32, #tpu.memory_space<vmem>>, vector<8x128xf32>,
    } else {
    }
    %c0 = arith.constant 0 : index
    %c0_1 = arith.constant 0 : index
    %3 = vector.load %arg2[%c0, %c0_1] : memref<8x32xf32, #tpu.memory_space<vmem>>, vector<8x32xf32>
    %c0_2 = arith.constant 0 : index
    %c0_3 = arith.constant 0 : index
    %4 = vector.load %arg3[%c0_2, %c0_3] : memref<8x32xf32, #tpu.memory_space<vmem>>, vector<8x32xf32>
    %5 = arith.subf %3, %4 : vector<8x32xf32>
    %cst = arith.constant 9.99999997E-7 : f32
    %6 = vector.broadcast %cst : f32 to vector<8x32xf32>
    %7 = arith.addf %5, %6 : vector<8x32xf32>
    %8 = arith.mulf %7, %7 : vector<8x32xf32>
    %c0_4 = arith.constant 0 : index
    %c0_5 = arith.constant 0 : index
    %9 = vector.load %arg6[%c0_4, %c0_5] : memref<8x128xf32, #tpu.memory_space<vmem>>, vector<8x1xf32>
    %cst_6 = arith.constant dense<0.000000e+00> : vector<8xf32>
    %10 = vector.multi_reduction <add>, %8, %cst_6 [1] : vector<8x32xf32> to vector<8xf32>
    %11 = vector.shape_cast %10 : vector<8xf32> to vector<8x1xf32>
    %12 = arith.addf %9, %11 : vector<8x1xf32>
    %c0_7 = arith.constant 0 : index
    %c0_8 = arith.constant 0 : index
    %13 = vector.load %arg6[%c0_7, %c0_8] : memref<8x128xf32, #tpu.memory_space<vmem>>, vector<8x1xf32>
    tpu.vector_store %arg6[%c0_7, %c0_8], %12 {strides = array<i32>} : memref<8x128xf32, #tpu.memory_space<vmem>>, vector<8x1xf32>,
    %c0_i32_9 = arith.constant 0 : i32
    %14 = arith.cmpi eq, %arg1, %c0_i32_9 : i32
    %15 = arith.extui %14 : i1 to i32
    %c0_i32_10 = arith.constant 0 : i32
    %16 = arith.cmpi ne, %15, %c0_i32_10 : i32
    scf.if %16 {
      %c0_11 = arith.constant 0 : index
      %c0_12 = arith.constant 0 : index
      %17 = vector.load %arg6[%c0_11, %c0_12] : memref<8x128xf32, #tpu.memory_space<vmem>>, vector<8x128xf32>
      %cst_13 = arith.constant dense<0.000000e+00> : vector<8xf32>
      %18 = vector.multi_reduction <add>, %17, %cst_13 [1] : vector<8x128xf32> to vector<8xf32>
      %19 = vector.shape_cast %18 : vector<8xf32> to vector<8x1xf32>
      %20 = math.sqrt %19 : vector<8x1xf32>
      %c0_14 = arith.constant 0 : index
      %c0_15 = arith.constant 0 : index
      %21 = vector.load %arg4[%c0_14, %c0_15] : memref<8x1xf32, #tpu.memory_space<vmem>>, vector<8x1xf32>
      %cst_16 = arith.constant 2.000000e+00 : f32
      %22 = vector.broadcast %cst_16 : f32 to vector<8x1xf32>
      %23 = arith.subf %22, %20 : vector<8x1xf32>
      %cst_17 = arith.constant 0.000000e+00 : f32
      %24 = vector.broadcast %cst_17 : f32 to vector<8x1xf32>
      %25 = arith.maximumf %23, %24 : vector<8x1xf32>
      %cst_18 = arith.constant 1.000000e+00 : f32
      %26 = vector.broadcast %cst_18 : f32 to vector<8x1xf32>
      %27 = arith.subf %26, %21 : vector<8x1xf32>
      %28 = arith.mulf %27, %19 : vector<8x1xf32>
      %29 = arith.mulf %25, %25 : vector<8x1xf32>
      %30 = arith.mulf %21, %29 : vector<8x1xf32>
      %31 = arith.addf %28, %30 : vector<8x1xf32>
      %32 = vector.shape_cast %31 : vector<8x1xf32> to vector<1x8x1xf32>
      %cst_19 = arith.constant dense<0.000000e+00> : vector<1xf32>
      %33 = vector.multi_reduction <add>, %32, %cst_19 [1, 2] : vector<1x8x1xf32> to vector<1xf32>
      %34 = vector.shape_cast %33 : vector<1xf32> to vector<1x1x1xf32>
      %35 = vector.extract %34[0, 0, 0] : f32 from vector<1x1x1xf32>
      %36 = vector.broadcast %35 : f32 to vector<1x8x128xf32>
      %c0_20 = arith.constant 0 : index
      %c0_21 = arith.constant 0 : index
      %c0_22 = arith.constant 0 : index
      %37 = vector.load %arg5[%c0_20, %c0_21, %c0_22] : memref<1x8x128xf32, #tpu.memory_space<vmem>>, vector<1x8x128xf32>
      tpu.vector_store %arg5[%c0_20, %c0_21, %c0_22], %36 {strides = array<i32>} : memref<1x8x128xf32, #tpu.memory_space<vmem>>, vector<1x8x128xf32>,
    } else {
    }
    return
  }
  func.func @transform_0(%arg0: i32, %arg1: i32) -> (i32, i32) {
    %c0_i32 = arith.constant 0 : i32
    return %arg0, %arg1 : i32, i32
  }
  func.func @transform_1(%arg0: i32, %arg1: i32) -> (i32, i32) {
    %c0_i32 = arith.constant 0 : i32
    return %arg0, %arg1 : i32, i32
  }
  func.func @transform_2(%arg0: i32, %arg1: i32) -> (i32, i32) {
    %c0_i32 = arith.constant 0 : i32
    %c0_i32_0 = arith.constant 0 : i32
    return %arg0, %c0_i32 : i32, i32
  }
  func.func @transform_3(%arg0: i32, %arg1: i32) -> (i32, i32, i32) {
    %c0_i32 = arith.constant 0 : i32
    %c0_i32_0 = arith.constant 0 : i32
    %c0_i32_1 = arith.constant 0 : i32
    return %arg0, %c0_i32, %c0_i32_0 : i32, i32, i32
  }
}

</mosaic_0001>

<bundles_post_ra>
// kernel: tpu_custom_call.1
= control target key start
LH: loop header
LB: loop body
LE: loop exit
PB: predicated region body
PF: predicated region fallthrough
CT: control target
= control target key end

     0   :  { %8 = vsyncpa [#allocation4], 0  ;;  %s203_s0 = inlined_call_operand.vmem [shape: f32[8,32], index: 0, kind: input, shape index: {}]   ;;  %s204_s1 = inlined_call_operand.hbm [shape: f32[8,32], index: 1, kind: input, shape index: {}]   ;;  %s205_s2 = inlined_call_operand.vmem [shape: f32[8,1], index: 2, kind: input, shape index: {}]   ;;  %s206_s3 = inlined_call_operand.hbm [shape: f32[1,8,128], index: 3, kind: output, shape index: {}]  }
   0x1   :  { %9 = vsyncpa [#allocation5], 0  ;;  %s148_s12 = smov [#allocation3]   ;;  %s100_s16 = scalar_lea.hbm %s204_s1, 128 }
   0x2   :  { %s18_s13 = sshll.u32 %s148_s12, 4  ;;  %p101_p0 = scmp.ne.s32.totalorder %s204_s1, %s100_s16  ;;  %s19_s13 = int_to_ptr.vmem [resolvable:$true] %s18_s13 }
   0x3   :  { %p104_p1 = scmp.lt.u32.totalorder %s100_s16, %s204_s1 }
   0x5   :  { %p106_p2 = pnand %p104_p1, %p101_p0 }
   0x7   :  { %109 = shalt.err (!%p106_p2)
}
   0x8   :  { %s110_s21 = scalar_lea.vmem %s19_s13, 128  ;;  %p115_p4 = scmp.lt.s32.totalorder %s19_s13, %s19_s13 }
   0x9   :  { %p111_p3 = scmp.ne.s32.totalorder %s19_s13, %s110_s21  ;;  %p116_p5 = scmp.lt.s32.totalorder %s110_s21, %s110_s21 }
   0xb   :  { %p117_p6 = por %p116_p5, %p115_p4 }
   0xd   :  { %p118_p7 = pnand %p117_p6, %p111_p3 }
   0xf   :  { %121 = shalt.err (!%p118_p7)
}
  0x10   :  { %21 = dma.hbm_to_vmem [thread:$0]  %s204_s1, 128, %s19_s13, [#allocation4]  }
  0x11   :  { %144 = dma.done.wait [#allocation4], 128  }
  0x12   :  { %145 = vsyncadd [#allocation4], 4294967168  ;;  %v149_v0 = vmov 0.0   ;;  %v32_v1 = vld [vmem:[%s203_s0] sm:$0xff]  ;;  %v33_v2 = vld [vmem:[#allocation3] sm:$0xff]  ;;  %vm38_vm0 = vcmask 261120  }
  0x13   :  { %31 = vst [vmem:[#allocation2] sm:$0xff] %v149_v0  ;;  %v34_v3 = vsub.f32 %v32_v1, %v33_v2  ;;  %vm43_vm1 = vcmask 7168   ;;  %v58_v15 = vld [vmem:[%s205_s2] sm:$0xff]  ;;  %s150_s26 = smov [#allocation6]  }
  0x14   :  { %v61_v18 = vsub.f32 1.0, %v58_v15  ;;  %s84_s2 = sshll.u32 %s150_s26, 4  ;;  %s85_s2 = int_to_ptr.vmem [resolvable:$true] %s84_s2 }
  0x15   :  { %v35_v4 = vadd.f32 1e-06, %v34_v3  ;;  %s122_s28 = scalar_lea.vmem %s85_s2, 128  ;;  %p127_p9 = scmp.lt.s32.totalorder %s85_s2, %s85_s2 }
  0x16   :  { %p123_p8 = scmp.ne.s32.totalorder %s85_s2, %s122_s28  ;;  %p128_p10 = scmp.lt.s32.totalorder %s122_s28, %s122_s28 }
  0x17   :  { %v36_v5 = vmul.f32 %v35_v4, %v35_v4 }
  0x18   :  { %p129_p11 = por %p128_p10, %p127_p9 }
  0x19   :  { %v39_v6 = vsel %vm38_vm0, %v36_v5, 0.0 }
  0x1a   :  { %40 = vadd.xlane.f32.xlu0 %v39_v6  ;;  %p130_p12 = pnand %p129_p11, %p123_p8 }
  0xa7   :  { %v41_v7 = vpop.xlane.xlu0 %40 }
  0xa8   :  { %44 = vst.msk [vmem:[#allocation2] sm:$0xff] %vm43_vm1, %v41_v7 }
  0xaf   :  { %v48_v8 = vld [vmem:[#allocation2] sm:$0xff] }
  0xb0   :  { %49 = vadd.xlane.f32.xlu0 %v48_v8 }
 0x13d   :  { %v50_v9 = vpop.xlane.xlu0 %49 }
 0x13e   :  { %98 = vrsqrt.f32 %v50_v9  ;;  %vm53_vm2 = vcmp.eq.f32.partialorder %v50_v9, inf  ;;  %v56_v12 = vand.u32 2147483648, %v50_v9  ;;  %vm55_vm3 = vcmp.eq.f32.partialorder %v50_v9, 0.0 }
 0x13f   :  { %v62_v20 = vmul.f32 %v61_v18, %v50_v9 }
 0x148   :  { %v99_v10 = vpop.eup %98 }
 0x149   :  { %v52_v11 = vmul.f32 %v99_v10, %v50_v9 }
 0x14b   :  { %v54_v13 = vsel %vm53_vm2, %v50_v9, %v52_v11 }
 0x14c   :  { %v57_v14 = vsel %vm55_vm3, %v56_v12, %v54_v13 }
 0x14d   :  { %v59_v16 = vsub.f32 2.0, %v57_v14 }
 0x14f   :  { %v60_v17 = vmax.f32 %v59_v16, 0.0 }
 0x151   :  { %v63_v19 = vmul.f32 %v60_v17, %v60_v17 }
 0x153   :  { %v64_v21 = vmul.f32 %v63_v19, %v58_v15 }
 0x155   :  { %v65_v22 = vadd.f32 %v64_v21, %v62_v20 }
 0x157   :  { %v66_v23 = vsel %vm43_vm1, %v65_v22, 0.0 }
 0x158   :  { %67 = vadd.xlane.f32.xlu1 %v66_v23 }
 0x1e5   :  { %v68_v24 = vpop.xlane.xlu1 %67 }
 0x1e6   :  { %v69_v25 = vrot.slane %v68_v24, 4 }
 0x1e8   :  { %v70_v26 = vadd.f32 %v69_v25, %v68_v24 }
 0x1ea   :  { %v71_v27 = vrot.slane %v70_v26, 2 }
 0x1ec   :  { %v72_v28 = vadd.f32 %v71_v27, %v70_v26 }
 0x1ee   :  { %v73_v29 = vrot.slane %v72_v28, 1 }
 0x1f0   :  { %v74_v30 = vadd.f32 %v73_v29, %v72_v28 }
 0x1f2   :  { %93 = vpush %v74_v30 }
 0x223   :  { %s94_s27 = spop %93 }
 0x224   :  { %v76_v31 = vstv %s94_s27 }
 0x225   :  { %77 = vst [vmem:[#allocation6] sm:$0xff] %v76_v31 }
 0x226   :  { %133 = shalt.err (!%p130_p12)
}
 0x227   :  { %s134_s4 = scalar_lea.hbm %s206_s3, 128 }
 0x228   :  { %p135_p13 = scmp.ne.s32.totalorder %s206_s3, %s134_s4  ;;  %p138_p0 = scmp.lt.u32.totalorder %s134_s4, %s206_s3 }
 0x22a   :  { %p140_p1 = pnand %p138_p0, %p135_p13 }
 0x22c   :  { %143 = shalt.err (!%p140_p1)
}
 0x22d   :  { %87 = dma.vmem_to_hbm [thread:$0]  %s85_s2, 128, %s206_s3, [#allocation5]  }
 0x22e   :  { %146 = dma.done.wait [#allocation5], 128  }
 0x22f   :  { %147 = vsyncadd [#allocation5], 4294967168 }
 0x230   :  { %91 = vsyncpa [#allocation4], 1 }
 0x231   :  { %92 = vsyncpa [#allocation5], 1 }

</bundles_post_ra>
